<compile_context>
chip_gen: v7x
topology: tpu7x:2x2x1
jax: 0.10.0
libtpu: 0.0.40
codegen_flags: <defaults>
</compile_context>

<pallas_src>
import numpy as np
import jax
import jax.numpy as jnp
from jax.experimental import pallas as pl
from jax.experimental.pallas import tpu as pltpu


# --------------------------------------------------------------------------
# Pallas kernel 1: fused 2x bilinear upsample (align_corners=False) +
# calculate_uncertainty.
#   out[r, c] = A_h @ x[r, c] @ A_w^T
#   unc[r, 0] = -|out[r, classes[r]]|
# --------------------------------------------------------------------------
def _upsample_unc_kernel(cls_ref, ah_ref, awT_ref, x_ref, o_ref, u_ref):
    r_tile, c_tile, H, W = x_ref.shape
    H2, W2 = 2 * H, 2 * W
    B = r_tile * c_tile
    ct = pl.program_id(1)

    # Zero-init the (resident across ct) uncertainty block: deterministic even
    # if classes[r] never falls inside any channel tile.
    @pl.when(ct == 0)
    def _():
        u_ref[...] = jnp.zeros_like(u_ref)

    xb = x_ref[...].reshape(B, H, W).astype(jnp.bfloat16)

    # ---- W-direction pass ----
    if H % 8 == 0:
        # Folded into the MXU M dimension: (B*H, W) @ (W, 2W).  The leading-dim
        # merge is sublane-tile aligned (H % 8 == 0) so the reshape is free.
        t = jnp.dot(xb.reshape(B * H, W), awT_ref[...],
                    preferred_element_type=jnp.float32)
        t = t.astype(jnp.bfloat16).reshape(B, H, W2)
    else:
        # Tiny early steps (H = 7/14/28): batched matmul with an in-register
        # broadcast of A_w^T (no HBM/VMEM duplication of the matrix).
        awT_b = jnp.broadcast_to(awT_ref[...], (B, W, W2))
        t = jnp.einsum('bhw,bwv->bhv', xb, awT_b,
                       preferred_element_type=jnp.float32).astype(jnp.bfloat16)

    # ---- H-direction pass (batched, shared 2-D A_h broadcast in-register) ----
    ah_b = jnp.broadcast_to(ah_ref[...], (B, H2, H))
    out = jnp.einsum('boh,bhv->bov', ah_b, t,
                     preferred_element_type=jnp.float32)        # (B, 2H, 2W) f32
    out = out.reshape(r_tile, c_tile, H2, W2)
    o_ref[...] = out.astype(o_ref.dtype)

    # ---- uncertainty from the in-register result (no o_ref re-read) ----
    r0 = pl.program_id(0) * r_tile
    ch_iota = jax.lax.broadcasted_iota(jnp.int32, (c_tile, H2, W2), 0)
    for rr in range(r_tile):
        local = cls_ref[r0 + rr] - ct * c_tile       # class index within tile

        @pl.when(jnp.logical_and(local >= 0, local < c_tile))
        def _(rr=rr, local=local):
            picked = jnp.sum(jnp.where(ch_iota == local, out[rr], 0.0), axis=0)
            u_ref[rr, 0] = -jnp.abs(picked)


def _bilinear_matrix(n_in):
    """(2*n_in, n_in) interpolation matrix reproducing F.interpolate(scale=2,
    mode='bilinear', align_corners=False) along one axis (weights are exact in
    bf16: 0.25/0.75/1.0)."""
    n_out = 2 * n_in
    d = np.arange(n_out, dtype=np.float64)
    src = np.maximum((d + 0.5) * (n_in / n_out) - 0.5, 0.0)
    i0 = np.minimum(np.floor(src).astype(np.int64), n_in - 1)
    i1 = np.minimum(i0 + 1, n_in - 1)
    w1 = src - i0
    w0 = 1.0 - w1
    A = np.zeros((n_out, n_in), np.float32)
    A[np.arange(n_out), i0] += w0.astype(np.float32)
    A[np.arange(n_out), i1] += w1.astype(np.float32)
    return A


# Elements of (r_tile * c_tile * H * W) per grid step; with the 4x-larger
# output block, f32 temporaries and double buffering this stays well under the
# 48 MiB limit below (and within v7x's 64 MiB physical VMEM).
_VMEM_ELEM_BUDGET = 128 * 1024


def upsample2x_with_uncertainty_pallas(x, classes):
    """x: (R, C, H, W) -> (upsampled (R, C, 2H, 2W), uncertainty (R, 1, 2H, 2W))."""
    R, C, H, W = x.shape
    H2, W2 = 2 * H, 2 * W
    hw = H * W

    # Channel tile: largest divisor of C whose per-instance block fits the budget.
    c_tile = 1
    for d in range(C, 0, -1):
        if C % d == 0 and d * hw <= _VMEM_ELEM_BUDGET:
            c_tile = d
            break
    n_ct = C // c_tile

    # Instance tile: fill the remaining budget; keep >= 2 r-steps when R >= 2 so
    # the "parallel" axis can still be split across v7x's two TensorCores; cap
    # the static unroll of the uncertainty-selection loop.
    r_tile = max(1, min(R, _VMEM_ELEM_BUDGET // (c_tile * hw)))
    if R >= 2:
        r_tile = min(r_tile, -(-R // 2))
    r_tile = min(r_tile, 32)
    n_r = -(-R // r_tile)
    R_pad = n_r * r_tile

    ah = jnp.asarray(_bilinear_matrix(H), dtype=jnp.bfloat16)       # (2H, H)
    awT = jnp.asarray(_bilinear_matrix(W).T, dtype=jnp.bfloat16)    # (W, 2W)

    if C == 1:
        cls = jnp.zeros((R_pad,), jnp.int32)                        # class-agnostic
    else:
        cls = classes.astype(jnp.int32)
        if R_pad > R:
            cls = jnp.pad(cls, (0, R_pad - R))
    x_p = x
    if R_pad > R:
        x_p = jnp.pad(x, ((0, R_pad - R), (0, 0), (0, 0), (0, 0)))

    grid_spec = pltpu.PrefetchScalarGridSpec(
        num_scalar_prefetch=1,
        grid=(n_r, n_ct),
        in_specs=[
            pl.BlockSpec((H2, H), lambda r, ct, c: (0, 0)),          # A_h (resident)
            pl.BlockSpec((W, W2), lambda r, ct, c: (0, 0)),          # A_w^T (resident)
            pl.BlockSpec((r_tile, c_tile, H, W), lambda r, ct, c: (r, ct, 0, 0)),
        ],
        out_specs=[
            pl.BlockSpec((r_tile, c_tile, H2, W2), lambda r, ct, c: (r, ct, 0, 0)),
            pl.BlockSpec((r_tile, 1, H2, W2), lambda r, ct, c: (r, 0, 0, 0)),
        ],
    )
    out, unc = pl.pallas_call(
        _upsample_unc_kernel,
        out_shape=(jax.ShapeDtypeStruct((R_pad, C, H2, W2), x.dtype),
                   jax.ShapeDtypeStruct((R_pad, 1, H2, W2), jnp.float32)),
        grid_spec=grid_spec,
        compiler_params=pltpu.CompilerParams(
            dimension_semantics=("parallel", "arbitrary"),
            vmem_limit_bytes=48 * 1024 * 1024),
    )(cls, ah, awT, x_p)
    if R_pad > R:
        out, unc = out[:R], unc[:R]
    return out, unc


# --------------------------------------------------------------------------
# Pallas kernel 2: StandardPointHead MLP over a lane-dense (C, R*P) layout.
#   x = cat(fine, coarse); for 3 layers: x = cat(relu(Conv1d(x)), coarse)
#   out = predictor(x)
# Per-layer concat of coarse features is folded into split weights, the four
# coarse-term matmuls are stacked into one, and the biases are folded into the
# same matmul via a ones-row appended to `coarse`.
# --------------------------------------------------------------------------
def _point_head_kernel(fine_ref, coarse_ref,
                       w1_ref, w2_ref, w3_ref, wp_ref, wc_ref, o_ref):
    fc_dim = w1_ref.shape[0]
    ncls = wp_ref.shape[0]
    fine = fine_ref[...]                               # (C_fine,  NT) bf16
    coarse = coarse_ref[...]                           # (C_cls+1, NT) bf16 (ones row)

    # All coarse contributions + biases in one matmul: (3*fc+ncls, NT) f32.
    z = jnp.dot(wc_ref[...], coarse, preferred_element_type=jnp.float32)

    h = jnp.maximum(jnp.dot(w1_ref[...], fine, preferred_element_type=jnp.float32)
                    + z[0:fc_dim], 0.0).astype(jnp.bfloat16)
    h = jnp.maximum(jnp.dot(w2_ref[...], h, preferred_element_type=jnp.float32)
                    + z[fc_dim:2 * fc_dim], 0.0).astype(jnp.bfloat16)
    h = jnp.maximum(jnp.dot(w3_ref[...], h, preferred_element_type=jnp.float32)
                    + z[2 * fc_dim:3 * fc_dim], 0.0).astype(jnp.bfloat16)
    o_ref[...] = (jnp.dot(wp_ref[...], h, preferred_element_type=jnp.float32)
                  + z[3 * fc_dim:3 * fc_dim + ncls]).astype(o_ref.dtype)


def point_head_pallas(fine, coarse, kparams, n_tile=1024):
    """fine: (C_fine, N), coarse: (C_cls, N) with N = R*P -> (num_class, N)."""
    C_fine, N = fine.shape
    C_cls = coarse.shape[0]
    ncls = kparams["wp"].shape[0]

    # Bias folding: ones-row appended to coarse pairs with the bias column in wc.
    coarse_aug = jnp.concatenate(
        [coarse, jnp.ones((1, N), coarse.dtype)], axis=0)          # (C_cls+1, N)

    n_tile = min(n_tile, max(128, -(-N // 128) * 128))             # don't over-pad small N
    n_pad = -(-N // n_tile) * n_tile
    fine_p = jnp.pad(fine, ((0, 0), (0, n_pad - N))).astype(jnp.bfloat16)
    coarse_p = jnp.pad(coarse_aug, ((0, 0), (0, n_pad - N))).astype(jnp.bfloat16)

    weights = [kparams["w1"], kparams["w2"], kparams["w3"], kparams["wp"],
               kparams["wc"]]
    w_specs = [pl.BlockSpec(w.shape, lambda n: (0, 0)) for w in weights]

    out = pl.pallas_call(
        _point_head_kernel,
        out_shape=jax.ShapeDtypeStruct((ncls, n_pad), jnp.float32),
        grid=(n_pad // n_tile,),
        in_specs=[pl.BlockSpec((C_fine, n_tile), lambda n: (0, n)),
                  pl.BlockSpec((C_cls + 1, n_tile), lambda n: (0, n))] + w_specs,
        out_specs=pl.BlockSpec((ncls, n_tile), lambda n: (0, n)),
        compiler_params=pltpu.CompilerParams(dimension_semantics=("parallel",)),
    )(fine_p, coarse_p, *weights)
    return out[:, :N]


def init_point_head_params(key, num_class, in_channel, fc_dim):
    """Deterministic synthetic weights for StandardPointHead (num_fc=3,
    coarse_pred_each_layer=True). Conv1d(k=1) == per-point matmul."""
    ks = jax.random.split(key, 8)

    def w(k, shape, scale=0.1):
        return scale * jax.random.normal(k, shape, jnp.float32)

    return {
        "w1_f": w(ks[0], (fc_dim, in_channel)),
        "w1_c": w(ks[1], (fc_dim, num_class)),
        "b1":   jnp.zeros((fc_dim, 1), jnp.float32),
        "w2_f": w(ks[2], (fc_dim, fc_dim)),
        "w2_c": w(ks[3], (fc_dim, num_class)),
        "b2":   jnp.zeros((fc_dim, 1), jnp.float32),
        "w3_f": w(ks[4], (fc_dim, fc_dim)),
        "w3_c": w(ks[5], (fc_dim, num_class)),
        "b3":   jnp.zeros((fc_dim, 1), jnp.float32),
        "wp_f": w(ks[6], (num_class, fc_dim)),
        "wp_c": w(ks[7], (num_class, num_class)),
        "bp":   jnp.zeros((num_class, 1), jnp.float32),
    }


def _prepare_kernel_params(p):
    """Cast fine-path weights to bf16; stack coarse-path weights and fold the
    biases in as an extra column (pairs with the ones-row in `coarse`)."""
    wc = jnp.concatenate([p["w1_c"], p["w2_c"], p["w3_c"], p["wp_c"]], axis=0)
    bias = jnp.concatenate([p["b1"], p["b2"], p["b3"], p["bp"]], axis=0)
    return {
        "w1": p["w1_f"].astype(jnp.bfloat16),
        "w2": p["w2_f"].astype(jnp.bfloat16),
        "w3": p["w3_f"].astype(jnp.bfloat16),
        "wp": p["wp_f"].astype(jnp.bfloat16),
        "wc": jnp.concatenate([wc, bias], axis=1).astype(jnp.bfloat16),
    }


# --------------------------------------------------------------------------
# Plain-JAX glue (gathers / top-k / coordinate math) — exact PyTorch semantics
# --------------------------------------------------------------------------
def _grid_sample_points(img, pts):
    """F.grid_sample(img[None], 2*pts-1, bilinear, zeros, align_corners=False).
    img: (C, H, W), pts: (P, 2) in [0,1] with (x, y) order -> (C, P)."""
    C, H, W = img.shape
    img_flat = img.reshape(C, H * W)
    ix = pts[:, 0] * W - 0.5
    iy = pts[:, 1] * H - 0.5
    ix0 = jnp.floor(ix)
    iy0 = jnp.floor(iy)
    ix1 = ix0 + 1.0
    iy1 = iy0 + 1.0
    wx1 = ix - ix0
    wx0 = 1.0 - wx1
    wy1 = iy - iy0
    wy0 = 1.0 - wy1

    def corner(iy_, ix_, w_):
        valid = (ix_ >= 0) & (ix_ <= W - 1) & (iy_ >= 0) & (iy_ <= H - 1)
        ic = jnp.clip(ix_, 0, W - 1).astype(jnp.int32)
        jc = jnp.clip(iy_, 0, H - 1).astype(jnp.int32)
        v = jnp.take(img_flat, jc * W + ic, axis=1)            # (C, P)
        return jnp.where(valid[None, :], v, 0.0) * w_[None, :]

    return (corner(iy0, ix0, wy0 * wx0) + corner(iy0, ix1, wy0 * wx1)
            + corner(iy1, ix0, wy1 * wx0) + corner(iy1, ix1, wy1 * wx1))


def point_sample(inp, point_coords):
    """inp (N, C, H, W), point_coords (N, P, 2) in [0,1] -> (N, C, P)."""
    return jax.vmap(_grid_sample_points)(inp, point_coords)


def get_uncertain_point_coords_on_grid(uncertainty_map, num_points):
    R, _, H, W = uncertainty_map.shape
    h_step = 1.0 / float(H)
    w_step = 1.0 / float(W)
    num_points = min(H * W, num_points)
    _, point_indices = jax.lax.top_k(uncertainty_map.reshape(R, H * W), num_points)
    point_indices = point_indices.astype(jnp.int32)
    xs = w_step / 2.0 + (point_indices % W).astype(jnp.float32) * w_step
    ys = h_step / 2.0 + (point_indices // W).astype(jnp.float32) * h_step
    point_coords = jnp.stack([xs, ys], axis=-1)
    return point_indices, point_coords


def get_point_coords_wrt_image(boxes, point_coords):
    x0, y0, x1, y1 = boxes[:, 0], boxes[:, 1], boxes[:, 2], boxes[:, 3]
    px = point_coords[:, :, 0] * (x1 - x0)[:, None] + x0[:, None]
    py = point_coords[:, :, 1] * (y1 - y0)[:, None] + y0[:, None]
    return jnp.stack([px, py], axis=-1)


def point_sample_fine_grained_features(features_list, feature_scales,
                                       boxes, point_coords):
    """Returns fine features in (C_total, R*P) layout (columns ordered by
    concatenated box index, then point) plus image-space point coords."""
    num_boxes = [int(b.shape[0]) for b in boxes]
    cat_boxes = jnp.concatenate(boxes, axis=0)
    point_coords_wrt_image = get_point_coords_wrt_image(cat_boxes, point_coords)
    offsets = np.cumsum([0] + num_boxes)
    cols = []
    for idx_img in range(len(boxes)):
        pcs = point_coords_wrt_image[offsets[idx_img]:offsets[idx_img + 1]]
        per_level = []
        for idx_f, fmap in enumerate(features_list):
            h, w = int(fmap.shape[2]), int(fmap.shape[3])
            scale = jnp.array([w, h], jnp.float32) / feature_scales[idx_f]
            pcs_scaled = (pcs / scale).reshape(-1, 2)
            per_level.append(_grid_sample_points(fmap[idx_img], pcs_scaled))
        cols.append(jnp.concatenate(per_level, axis=0))        # (C_total, n_i*P)
    return jnp.concatenate(cols, axis=1), point_coords_wrt_image


# --------------------------------------------------------------------------
# PointRendHeads (inference forward)
# --------------------------------------------------------------------------
class PointRendHeadsPallas:
    def __init__(self, num_class, in_channel=256, key=None):
        self._feature_scales = {'0': 1.0 / 4, '1': 1.0 / 8,
                                '2': 1.0 / 16, '3': 1.0 / 32}
        self.mask_point_in_features = ['0']
        self.mask_point_subdivision_steps = 5
        self.mask_point_subdivision_num_points = 28 * 28
        self.num_class = num_class
        self.in_channel = in_channel
        self.params = init_point_head_params(
            key if key is not None else jax.random.PRNGKey(42),
            num_class, in_channel, in_channel)
        self.kparams = _prepare_kernel_params(self.params)

    def __call__(self, features, mask_coarse_logits, instances):
        mask_features_list = [features[k] for k in self.mask_point_in_features]
        features_scales = [self._feature_scales[k]
                           for k in self.mask_point_in_features]

        pred_boxes = [x['pred_boxes'] for x in instances]
        pred_classes = jnp.concatenate([x['pred_classes'] for x in instances])
        if pred_classes.shape[0] == 0:
            return mask_coarse_logits

        num_class = mask_coarse_logits.shape[1]
        mask_logits = mask_coarse_logits
        for step in range(self.mask_point_subdivision_steps):
            # Fused upsample + uncertainty (single Pallas call).
            mask_logits, uncertainty_map = upsample2x_with_uncertainty_pallas(
                mask_logits, pred_classes)
            H, W = mask_logits.shape[-2:]
            if (self.mask_point_subdivision_num_points >= 4 * H * W
                    and step < self.mask_point_subdivision_steps - 1):
                continue

            point_indices, point_coords = get_uncertain_point_coords_on_grid(
                uncertainty_map, self.mask_point_subdivision_num_points)

            fine_cp, _ = point_sample_fine_grained_features(
                mask_features_list, features_scales, pred_boxes, point_coords)
            coarse = point_sample(mask_coarse_logits, point_coords)   # (R, C, P)
            R, C_cls, P = coarse.shape
            coarse_cp = coarse.transpose(1, 0, 2).reshape(C_cls, R * P)

            point_logits_cp = point_head_pallas(fine_cp, coarse_cp, self.kparams)
            point_logits = point_logits_cp.reshape(num_class, R, P).transpose(1, 0, 2)

            Rm, Cm, Hm, Wm = mask_logits.shape
            flat = mask_logits.reshape(Rm, Cm, Hm * Wm)
            flat = jax.vmap(lambda f, idx, v: f.at[:, idx].set(v))(
                flat, point_indices, point_logits.astype(flat.dtype))
            mask_logits = flat.reshape(Rm, Cm, Hm, Wm)
        return mask_logits


# --------------------------------------------------------------------------
if __name__ == "__main__":
    key = jax.random.PRNGKey(0)
    num_class = 3
    in_channel = 32                  # PointRendHeads kwarg in_channel
    img_size = 64
    feat_hw = img_size // 4          # feature level '0' at scale 1/4

    k_feat, k_mask = jax.random.split(key, 2)
    n_images = 2
    features = {'0': jax.random.normal(
        k_feat, (n_images, in_channel, feat_hw, feat_hw), jnp.float32)}

    # per-image instances: image 0 -> 1 box, image 1 -> 2 boxes (R = 3 masks)
    instances = [
        {'pred_boxes': jnp.array([[4.0, 6.0, 40.0, 50.0]], jnp.float32),
         'pred_classes': jnp.array([1], jnp.int32)},
        {'pred_boxes': jnp.array([[10.0, 8.0, 60.0, 44.0],
                                  [2.0, 2.0, 30.0, 30.0]], jnp.float32),
         'pred_classes': jnp.array([0, 2], jnp.int32)},
    ]
    R = 3
    mask_coarse_logits = jax.random.normal(
        k_mask, (R, num_class, 7, 7), jnp.float32)

    model = PointRendHeadsPallas(num_class, in_channel=in_channel,
                                 key=jax.random.PRNGKey(42))
    out = model(features, mask_coarse_logits, instances)
    out = jax.block_until_ready(out)
    assert out.shape == (R, num_class, 7 * 2 ** 5, 7 * 2 ** 5), out.shape
    assert bool(jnp.all(jnp.isfinite(out)))
    print("KERNEL_OK")
</pallas_src>

<mosaic_0001>
module attributes {stable_mosaic.version = 11 : i64} {
  func.func @_upsample_unc_kernel(%arg0: i32, %arg1: i32, %arg2: memref<4xi32, #tpu.memory_space<smem>>, %arg3: memref<14x7xbf16, #tpu.memory_space<vmem>>, %arg4: memref<7x14xbf16, #tpu.memory_space<vmem>>, %arg5: memref<2x3x7x7xf32, #tpu.memory_space<vmem>>, %arg6: memref<2x3x14x14xf32, #tpu.memory_space<vmem>>, %arg7: memref<2x1x14x14xf32, #tpu.memory_space<vmem>>) attributes {dimension_semantics = [#tpu.dimension_semantics<parallel>, #tpu.dimension_semantics<arbitrary>], iteration_bounds = array<i64: 2, 1>, scalar_prefetch = 1 : i64, scratch_operands = 0 : i64, tpu.core_type = #tpu.core_type<tc>, window_params = [{pipeline_mode = #tpu.pipeline_mode<synchronous>, transform_indices = @transform_0, window_bounds = array<i64: 14, 7>}, {pipeline_mode = #tpu.pipeline_mode<synchronous>, transform_indices = @transform_1, window_bounds = array<i64: 7, 14>}, {transform_indices = @transform_2, window_bounds = array<i64: 2, 3, 7, 7>}, {transform_indices = @transform_3, window_bounds = array<i64: 2, 3, 14, 14>}, {transform_indices = @transform_4, window_bounds = array<i64: 2, 1, 14, 14>}]} {
    %c0_i32 = arith.constant 0 : i32
    %0 = arith.cmpi eq, %arg1, %c0_i32 : i32
    %1 = arith.extui %0 : i1 to i32
    %c0_i32_0 = arith.constant 0 : i32
    %2 = arith.cmpi ne, %1, %c0_i32_0 : i32
    scf.if %2 {
      %cst_21 = arith.constant 0.000000e+00 : f32
      %39 = vector.broadcast %cst_21 : f32 to vector<2x1x14x14xf32>
      %c0_22 = arith.constant 0 : index
      %c0_23 = arith.constant 0 : index
      %c0_24 = arith.constant 0 : index
      %c0_25 = arith.constant 0 : index
      %40 = vector.load %arg7[%c0_22, %c0_23, %c0_24, %c0_25] : memref<2x1x14x14xf32, #tpu.memory_space<vmem>>, vector<2x1x14x14xf32>
      tpu.vector_store %arg7[%c0_22, %c0_23, %c0_24, %c0_25], %39 {strides = array<i32>} : memref<2x1x14x14xf32, #tpu.memory_space<vmem>>, vector<2x1x14x14xf32>,
    } else {
    }
    %c0 = arith.constant 0 : index
    %c0_1 = arith.constant 0 : index
    %c0_2 = arith.constant 0 : index
    %c0_3 = arith.constant 0 : index
    %3 = vector.load %arg5[%c0, %c0_1, %c0_2, %c0_3] : memref<2x3x7x7xf32, #tpu.memory_space<vmem>>, vector<2x3x7x7xf32>
    %4 = vector.shape_cast %3 : vector<2x3x7x7xf32> to vector<6x7x7xf32>
    %5 = arith.truncf %4 : vector<6x7x7xf32> to vector<6x7x7xbf16>
    %c0_4 = arith.constant 0 : index
    %c0_5 = arith.constant 0 : index
    %6 = vector.load %arg4[%c0_4, %c0_5] : memref<7x14xbf16, #tpu.memory_space<vmem>>, vector<7x14xbf16>
    %7 = vector.shape_cast %6 : vector<7x14xbf16> to vector<1x7x14xbf16>
    %8 = vector.broadcast %7 : vector<1x7x14xbf16> to vector<6x7x14xbf16>
    "tpu.trace_start"() <{level = 10 : i32, message = "bhw,bwv->bhv"}> : () -> ()
    %cst = arith.constant dense<0.000000e+00> : vector<6x7x14xf32>
    %9 = tpu.matmul %5, %8, %cst {dimension_numbers = #tpu.dot_dimension_numbers<[2], [1], [1], [2], [0, 0, 0, 1, 1, 2], [0], [0]>} : vector<6x7x7xbf16>, vector<6x7x14xbf16>, vector<6x7x14xf32> -> vector<6x7x14xf32>
    "tpu.trace_stop"() : () -> ()
    %10 = arith.truncf %9 : vector<6x7x14xf32> to vector<6x7x14xbf16>
    %c0_6 = arith.constant 0 : index
    %c0_7 = arith.constant 0 : index
    %11 = vector.load %arg3[%c0_6, %c0_7] : memref<14x7xbf16, #tpu.memory_space<vmem>>, vector<14x7xbf16>
    %12 = vector.shape_cast %11 : vector<14x7xbf16> to vector<1x14x7xbf16>
    %13 = vector.broadcast %12 : vector<1x14x7xbf16> to vector<6x14x7xbf16>
    "tpu.trace_start"() <{level = 10 : i32, message = "boh,bhv->bov"}> : () -> ()
    %cst_8 = arith.constant dense<0.000000e+00> : vector<6x14x14xf32>
    %14 = tpu.matmul %13, %10, %cst_8 {dimension_numbers = #tpu.dot_dimension_numbers<[2], [1], [1], [2], [0, 0, 0, 1, 1, 2], [0], [0]>} : vector<6x14x7xbf16>, vector<6x7x14xbf16>, vector<6x14x14xf32> -> vector<6x14x14xf32>
    "tpu.trace_stop"() : () -> ()
    %15 = vector.shape_cast %14 : vector<6x14x14xf32> to vector<2x3x14x14xf32>
    %c0_9 = arith.constant 0 : index
    %c0_10 = arith.constant 0 : index
    %c0_11 = arith.constant 0 : index
    %c0_12 = arith.constant 0 : index
    %16 = vector.load %arg6[%c0_9, %c0_10, %c0_11, %c0_12] : memref<2x3x14x14xf32, #tpu.memory_space<vmem>>, vector<2x3x14x14xf32>
    tpu.vector_store %arg6[%c0_9, %c0_10, %c0_11, %c0_12], %15 {strides = array<i32>} : memref<2x3x14x14xf32, #tpu.memory_space<vmem>>, vector<2x3x14x14xf32>,
    %c2_i32 = arith.constant 2 : i32
    %17 = arith.muli %arg0, %c2_i32 : i32
    %18 = tpu.iota {dimensions = array<i32: 0>} : vector<3x14x14xi32>
    %c0_i32_13 = arith.constant 0 : i32
    %19 = arith.addi %17, %c0_i32_13 : i32
    %20 = arith.index_cast %19 : i32 to index
    %21 = memref.load %arg2[%20] : memref<4xi32, #tpu.memory_space<smem>>
    %c3_i32 = arith.constant 3 : i32
    %22 = arith.muli %arg1, %c3_i32 : i32
    %23 = arith.subi %21, %22 : i32
    %c0_i32_14 = arith.constant 0 : i32
    %24 = arith.cmpi sge, %23, %c0_i32_14 : i32
    %c3_i32_15 = arith.constant 3 : i32
    %25 = arith.cmpi slt, %23, %c3_i32_15 : i32
    %26 = arith.andi %24, %25 : i1
    %27 = arith.extui %26 : i1 to i32
    %c0_i32_16 = arith.constant 0 : i32
    %28 = arith.cmpi ne, %27, %c0_i32_16 : i32
    scf.if %28 {
      %39 = vector.broadcast %23 : i32 to vector<3x14x14xi32>
      %40 = arith.cmpi eq, %18, %39 : vector<3x14x14xi32>
      %41 = vector.extract_strided_slice %15 {offsets = [0, 0, 0, 0], sizes = [1, 3, 14, 14], strides = [1, 1, 1, 1]} : vector<2x3x14x14xf32> to vector<1x3x14x14xf32>
      %42 = vector.shape_cast %41 : vector<1x3x14x14xf32> to vector<3x14x14xf32>
      %cst_21 = arith.constant 0.000000e+00 : f32
      %43 = vector.broadcast %cst_21 : f32 to vector<3x14x14xf32>
      %44 = arith.select %40, %42, %43 : vector<3x14x14xi1>, vector<3x14x14xf32>
      %cst_22 = arith.constant dense<0.000000e+00> : vector<14x14xf32>
      %45 = vector.multi_reduction <add>, %44, %cst_22 [0] : vector<3x14x14xf32> to vector<14x14xf32>
      %46 = math.absf %45 : vector<14x14xf32>
      %cst_23 = arith.constant 0.000000e+00 : f32
      %47 = vector.broadcast %cst_23 : f32 to vector<14x14xf32>
      %48 = arith.subf %47, %46 : vector<14x14xf32>
      %c0_24 = arith.constant 0 : index
      %c0_25 = arith.constant 0 : index
      %c0_26 = arith.constant 0 : index
      %c0_27 = arith.constant 0 : index
      %49 = vector.load %arg7[%c0_24, %c0_25, %c0_26, %c0_27] : memref<2x1x14x14xf32, #tpu.memory_space<vmem>>, vector<1x1x14x14xf32>
      %50 = vector.shape_cast %49 : vector<1x1x14x14xf32> to vector<14x14xf32>
      %51 = vector.shape_cast %48 : vector<14x14xf32> to vector<1x1x14x14xf32>
      tpu.vector_store %arg7[%c0_24, %c0_25, %c0_26, %c0_27], %51 {strides = array<i32>} : memref<2x1x14x14xf32, #tpu.memory_space<vmem>>, vector<1x1x14x14xf32>,
    } else {
    }
    %c1_i32 = arith.constant 1 : i32
    %29 = arith.addi %17, %c1_i32 : i32
    %30 = arith.index_cast %29 : i32 to index
    %31 = memref.load %arg2[%30] : memref<4xi32, #tpu.memory_space<smem>>
    %c3_i32_17 = arith.constant 3 : i32
    %32 = arith.muli %arg1, %c3_i32_17 : i32
    %33 = arith.subi %31, %32 : i32
    %c0_i32_18 = arith.constant 0 : i32
    %34 = arith.cmpi sge, %33, %c0_i32_18 : i32
    %c3_i32_19 = arith.constant 3 : i32
    %35 = arith.cmpi slt, %33, %c3_i32_19 : i32
    %36 = arith.andi %34, %35 : i1
    %37 = arith.extui %36 : i1 to i32
    %c0_i32_20 = arith.constant 0 : i32
    %38 = arith.cmpi ne, %37, %c0_i32_20 : i32
    scf.if %38 {
      %39 = vector.broadcast %33 : i32 to vector<3x14x14xi32>
      %40 = arith.cmpi eq, %18, %39 : vector<3x14x14xi32>
      %41 = vector.extract_strided_slice %15 {offsets = [1, 0, 0, 0], sizes = [1, 3, 14, 14], strides = [1, 1, 1, 1]} : vector<2x3x14x14xf32> to vector<1x3x14x14xf32>
      %42 = vector.shape_cast %41 : vector<1x3x14x14xf32> to vector<3x14x14xf32>
      %cst_21 = arith.constant 0.000000e+00 : f32
      %43 = vector.broadcast %cst_21 : f32 to vector<3x14x14xf32>
      %44 = arith.select %40, %42, %43 : vector<3x14x14xi1>, vector<3x14x14xf32>
      %cst_22 = arith.constant dense<0.000000e+00> : vector<14x14xf32>
      %45 = vector.multi_reduction <add>, %44, %cst_22 [0] : vector<3x14x14xf32> to vector<14x14xf32>
      %46 = math.absf %45 : vector<14x14xf32>
      %cst_23 = arith.constant 0.000000e+00 : f32
      %47 = vector.broadcast %cst_23 : f32 to vector<14x14xf32>
      %48 = arith.subf %47, %46 : vector<14x14xf32>
      %c1 = arith.constant 1 : index
      %c0_24 = arith.constant 0 : index
      %c0_25 = arith.constant 0 : index
      %c0_26 = arith.constant 0 : index
      %49 = vector.load %arg7[%c1, %c0_24, %c0_25, %c0_26] : memref<2x1x14x14xf32, #tpu.memory_space<vmem>>, vector<1x1x14x14xf32>
      %50 = vector.shape_cast %49 : vector<1x1x14x14xf32> to vector<14x14xf32>
      %51 = vector.shape_cast %48 : vector<14x14xf32> to vector<1x1x14x14xf32>
      tpu.vector_store %arg7[%c1, %c0_24, %c0_25, %c0_26], %51 {strides = array<i32>} : memref<2x1x14x14xf32, #tpu.memory_space<vmem>>, vector<1x1x14x14xf32>,
    } else {
    }
    return
  }
  func.func @transform_0(%arg0: i32, %arg1: i32, %arg2: memref<4xi32, #tpu.memory_space<smem>>) -> (i32, i32) {
    %c0_i32 = arith.constant 0 : i32
    %c0_i32_0 = arith.constant 0 : i32
    %c0_i32_1 = arith.constant 0 : i32
    return %c0_i32, %c0_i32_0 : i32, i32
  }
  func.func @transform_1(%arg0: i32, %arg1: i32, %arg2: memref<4xi32, #tpu.memory_space<smem>>) -> (i32, i32) {
    %c0_i32 = arith.constant 0 : i32
    %c0_i32_0 = arith.constant 0 : i32
    %c0_i32_1 = arith.constant 0 : i32
    return %c0_i32, %c0_i32_0 : i32, i32
  }
  func.func @transform_2(%arg0: i32, %arg1: i32, %arg2: memref<4xi32, #tpu.memory_space<smem>>) -> (i32, i32, i32, i32) {
    %c0_i32 = arith.constant 0 : i32
    %c0_i32_0 = arith.constant 0 : i32
    %c0_i32_1 = arith.constant 0 : i32
    return %arg0, %arg1, %c0_i32, %c0_i32_0 : i32, i32, i32, i32
  }
  func.func @transform_3(%arg0: i32, %arg1: i32, %arg2: memref<4xi32, #tpu.memory_space<smem>>) -> (i32, i32, i32, i32) {
    %c0_i32 = arith.constant 0 : i32
    %c0_i32_0 = arith.constant 0 : i32
    %c0_i32_1 = arith.constant 0 : i32
    return %arg0, %arg1, %c0_i32, %c0_i32_0 : i32, i32, i32, i32
  }
  func.func @transform_4(%arg0: i32, %arg1: i32, %arg2: memref<4xi32, #tpu.memory_space<smem>>) -> (i32, i32, i32, i32) {
    %c0_i32 = arith.constant 0 : i32
    %c0_i32_0 = arith.constant 0 : i32
    %c0_i32_1 = arith.constant 0 : i32
    %c0_i32_2 = arith.constant 0 : i32
    return %arg0, %c0_i32, %c0_i32_0, %c0_i32_1 : i32, i32, i32, i32
  }
}

</mosaic_0001>

<bundles_post_ra>
// kernel: tpu_custom_call.1
= control target key start
LH: loop header
LB: loop body
LE: loop exit
PB: predicated region body
PF: predicated region fallthrough
CT: control target
= control target key end

     0   :  { %s1472_s0 = inlined_call_operand.vmem [shape: s32[4], index: 0, kind: input, shape index: {}]   ;;  %s1473_s1 = inlined_call_operand.vmem [shape: bf16[14,7], index: 1, kind: input, shape index: {}]   ;;  %s1474_s2 = inlined_call_operand.vmem [shape: bf16[7,14], index: 2, kind: input, shape index: {}]   ;;  %s1475_s3 = inlined_call_operand.vmem [shape: f32[4,3,7,7], index: 3, kind: input, shape index: {}]   ;;  %s1476_s4 = inlined_call_operand.vmem [shape: f32[4,3,14,14], index: 4, kind: output, shape index: {0}]   ;;  %s1477_s5 = inlined_call_operand.vmem [shape: f32[4,1,14,14], index: 5, kind: output, shape index: {1}]  }
   0x1   :  { %s11_s20 = sshll.u32 %s1472_s0, 4  ;;  %s12_s20 = int_to_ptr.vmem [resolvable:$true] %s11_s20 }
   0x2   :  { %s1216_s21 = scalar_lea.vmem %s12_s20, 16  ;;  %p1221_p1 = scmp.lt.s32.totalorder %s12_s20, %s12_s20 }
   0x3   :  { %p1217_p0 = scmp.ne.s32.totalorder %s12_s20, %s1216_s21  ;;  %p1222_p2 = scmp.lt.s32.totalorder %s1216_s21, %s1216_s21 }
   0x5   :  { %p1223_p3 = por %p1222_p2, %p1221_p1 }
   0x7   :  { %p1224_p4 = pnand %p1223_p3, %p1217_p0 }
   0x9   :  { %1227 = shalt.err (!%p1224_p4)  }
   0xa   :  { %s1254_s22 = smov [#allocation3]  }
   0xb   :  { %14 = dma.vmem_to_smem %s12_s20, 16, %s1254_s22, [#allocation2] }
   0xc   :  { %1240 = dma.done.wait [#allocation2], 16 }
   0xd   :  { %1241 = vsyncadd [#allocation2], 4294967280 }
   0xe   :  { %16 = sfence }
   0xf   :  { %s1291_s23 = smov 0   ;;  %s1293_s24 = smov 0  }
  0x10   :  { %s1295_s25 = smov 0  }
  0x11 LB: > { %s34_s0 = sadd.s32 1, %s1248_s24  ;;  %p1062_p5 = scmp.ge.s32.totalorder %s1252_s25, 1  ;;  %s1252_s25 = sphi %s1295_s25, %s22_s25   ;;  %s1248_s24 = sphi %s1293_s24, %s1480_s24   ;;  %s1244_s23 = sphi %s1291_s23, %s1479_s23  }
  0x12   : > { %p36_p6 = scmp.ge.s32.totalorder %s34_s0, 2  ;;  %p195_p7 = scmp.lt.s32.totalorder %s1252_s25, 3 }
  0x14   : > { %s1482_s0 = smov (%p36_p6, %s34_s0), 0  ;;  %p196_p8 = pnand %p1062_p5, %p195_p7 }
  0x15   : > { %v293_v0 = vld [vmem:[%s1474_s2] sm:$0xf] (!%p196_p8)  ;;  %vm298_vm0 = vcmask (!%p196_p8), 1042432   ;;  %vm299_vm1 = vcmask (!%p196_p8), 1043456   ;;  %v1255_v1 = vmov (!%p196_p8), 0.0   ;;  %v1256_v2 = vmov (!%p196_p8), 65535  }
  0x16   : > { %199 = sbr.rel (%p196_p8) target bundleno = 512 (0x200), region = 32  ;;  %1113 = vmatprep.subr.bf16.mxu0 (!%p196_p8), %v1255_v1  ;;  %1119 = vmatprep.subr.bf16.mxu1 (!%p196_p8), %v1255_v1  ;;  %v300_v3 = vsel (!%p196_p8), %vm298_vm0, 4294967295, %v1256_v2  ;;  %s1314_s28 = sshll.u32 (!%p196_p8), %s1244_s23, 1  ;;  %vm1257_vm2 = vmmov (!%p196_p8), 0   ;;  %vm294_vm3 = vcmask (!%p196_p8), 56320   ;;  %vm275_vm4 = vcmask (!%p196_p8), 113664  }
  0x17   : > { %v1316_v4 = vsel (!%p196_p8), %vm299_vm1, %v300_v3, 0  ;;  %1115 = vmatprep.mubr.msk.bf16.mxu0 (!%p196_p8), %vm1257_vm2, %v1255_v1  ;;  %1121 = vmatprep.mubr.msk.bf16.mxu1 (!%p196_p8), %vm1257_vm2, %v1255_v1  ;;  %p240_p9 = scmp.lt.s32.totalorder (!%p196_p8), %s1314_s28, 3  ;;  %s1324_s29 = sld [smem:[#allocation3 + %s1314_s28]] (!%p196_p8)  ;;  %v1215_v30 = vld [vmem:[%s1473_s1] sm:$0x7f] (!%p196_p8)   ;;  %vm277_vm5 = vcmask (!%p196_p8), 111616  }
  0x18   : > { %v303_v5 = vand.u32 (!%p196_p8), %v1316_v4, %v293_v0 }
  0x1a   : > { %1114 = vmatpush3.bf16.msra.mxu0 (!%p196_p8), %v303_v5  ;;  %1120 = vmatpush3.bf16.msra.mxu1 (!%p196_p8), %v303_v5 }
  0x1b   : > { %1125 = vmatprep.subr.bf16.mxu0 (!%p196_p8), %v1255_v1  ;;  %1131 = vmatprep.subr.bf16.mxu1 (!%p196_p8), %v1255_v1 }
  0x1d   : > { %s1328_s30 = scalar_select %p240_p9, %s1314_s28, 3 }
  0x1e   : > { %p858_p10 = scmp.ge.s32.totalorder %s1324_s29, 0  ;;  %p859_p11 = scmp.lt.s32.totalorder %s1324_s29, 3 }
  0x1f   : > { %s1185_s6 = smul.u32 24, %s1328_s30  ;;  %s1088_s11 = sshll.u32 %s1328_s30, 4 }
  0x20   : > { %p1338_p12 = pnand %p859_p11, %p858_p10  ;;  %s1368_s14 = scalar_lea.vmem %s1477_s5, %s1088_s11 }
  0x21   : > { %s247_s9 = scalar_lea.vmem %s1475_s3, %s1185_s6  ;;  %276 = vst.msk [vmem:[%s1368_s14] sm:$0xff] %vm275_vm4, %v1255_v1  ;;  %279 = vst.msk [vmem:[%s1368_s14 + $0x10] sm:$0xff] %vm275_vm4, %v1255_v1  ;;  %s1186_s17 = smul.u32 48, %s1328_s30 }
  0x22   : > { %v281_v6 = vld [vmem:[%s247_s9] sm:$0x7f]  ;;  %v282_v7 = vld [vmem:[%s247_s9 + $0x8] sm:$0x7f]  ;;  %v283_v10 = vld [vmem:[%s247_s9 + $0x10] sm:$0x7f] }
  0x23   : > { %v287_v8 = vpack.c.bf16 %v281_v6, %v281_v6  ;;  %v288_v9 = vpack.c.bf16 %v282_v7, %v282_v7  ;;  %v284_v11 = vld [vmem:[%s247_s9 + $0x18] sm:$0x7f]  ;;  %v289_v12 = vpack.c.bf16 %v283_v10, %v283_v10  ;;  %v285_v14 = vld [vmem:[%s247_s9 + $0x20] sm:$0x7f]  ;;  %v286_v15 = vld [vmem:[%s247_s9 + $0x28] sm:$0x7f]  ;;  %s1413_s20 = scalar_lea.vmem %s1476_s4, %s1186_s17 }
  0x24   : > { %v290_v13 = vpack.c.bf16 %v284_v11, %v284_v11  ;;  %v291_v16 = vpack.c.bf16 %v285_v14, %v285_v14  ;;  %v292_v17 = vpack.c.bf16 %v286_v15, %v286_v15  ;;  %278 = vst.msk [vmem:[%s1368_s14 + $0x8] sm:$0x3f] %vm277_vm5, %v1255_v1  ;;  %280 = vst.msk [vmem:[%s1368_s14 + $0x18] sm:$0x3f] %vm277_vm5, %v1255_v1  ;;  %v864_v15 = vstv (!%p1338_p12), %s1324_s29 }
  0x25   : > { %1116 = vmatmul.mubr.msk.bf16.vlgmr.msra.gmra.mrb[0].mxu0 %vm294_vm3, %v287_v8  ;;  %1122 = vmatmul.mubr.msk.bf16.vlgmr.msra.gmra.mrb[0].mxu1 %vm294_vm3, %v288_v9  ;;  %vm865_vm6 = vcmp.eq.s32.totalorder (!%p1338_p12), %v864_v15, 0  ;;  %vm866_vm7 = vcmp.eq.s32.totalorder (!%p1338_p12), %v864_v15, 1  ;;  %vm867_vm8 = vcmp.eq.s32.totalorder (!%p1338_p12), %v864_v15, 2 }
  0x26   : > { %1126 = vmatpush3.bf16.msra.mxu0 %v303_v5  ;;  %1132 = vmatpush3.bf16.msra.mxu1 %v303_v5 }
  0x27   : > { %1127 = vmatprep.mubr.msk.bf16.mxu0 %vm1257_vm2, %v1255_v1  ;;  %1133 = vmatprep.mubr.msk.bf16.mxu1 %vm1257_vm2, %v1255_v1 }
  0x28   : > { %1137 = vmatprep.subr.bf16.mxu0 %v1255_v1  ;;  %1143 = vmatprep.subr.bf16.mxu1 %v1255_v1 }
  0x2d   : > { %1128 = vmatmul.mubr.msk.bf16.vlgmr.msra.gmra.mrb[4].mxu0 %vm294_vm3, %v289_v12  ;;  %1134 = vmatmul.mubr.msk.bf16.vlgmr.msra.gmra.mrb[4].mxu1 %vm294_vm3, %v290_v13 }
  0x2e   : > { %1138 = vmatpush3.bf16.msra.mxu0 %v303_v5  ;;  %1144 = vmatpush3.bf16.msra.mxu1 %v303_v5 }
  0x2f   : > { %1139 = vmatprep.mubr.msk.bf16.mxu0 %vm1257_vm2, %v1255_v1  ;;  %1145 = vmatprep.mubr.msk.bf16.mxu1 %vm1257_vm2, %v1255_v1 }
  0x30   : > { %1149 = vmatprep.subr.bf16.mxu0 %v1255_v1  ;;  %1155 = vmatprep.subr.bf16.mxu1 %v1255_v1 }
  0x35   : > { %1140 = vmatmul.mubr.msk.bf16.vlgmr.msra.gmra.mrb[8].mxu0 %vm294_vm3, %v291_v16  ;;  %1146 = vmatmul.mubr.msk.bf16.vlgmr.msra.gmra.mrb[8].mxu1 %vm294_vm3, %v292_v17 }
  0x36   : > { %1151 = vmatprep.mubr.msk.bf16.mxu0 %vm1257_vm2, %v1255_v1  ;;  %1157 = vmatprep.mubr.msk.bf16.mxu1 %vm1257_vm2, %v1255_v1 }
  0xf8   : > { %v339_v18 = vpop.f32.mrb[0].mxu0  ;;  %v382_v19 = vpop.f32.mrb[0].mxu1 }
  0xf9   : > { %v560_v20 = vpack.c.bf16 %v339_v18, %v339_v18  ;;  %v561_v21 = vpack.c.bf16 %v382_v19, %v382_v19  ;;  %v1117_v22 = vpop.f32.mrb[1].mxu0  ;;  %v1123_v23 = vpop.f32.mrb[1].mxu1 }
  0xfa   : > { %v342_v24 = vpop.f32.mrb[2].mxu0  ;;  %v385_v25 = vpop.f32.mrb[2].mxu1 }
  0xfb   : > { %v577_v26 = vand.u32 %v560_v20, %v1316_v4  ;;  %v621_v27 = vand.u32 %v561_v21, %v1316_v4  ;;  %v1118_v28 = vpop.f32.mrb[3].mxu0  ;;  %v1124_v29 = vpop.f32.mrb[3].mxu1 }
  0xfd   : > { %1150 = vmatpush3.bf16.msra.mxu0 %v577_v26  ;;  %1156 = vmatpush3.bf16.msra.mxu1 %v621_v27 }
  0xfe   : > { %1161 = vmatprep.subr.bf16.mxu0 %v1255_v1  ;;  %1167 = vmatprep.subr.bf16.mxu1 %v1255_v1 }
 0x100   : > { %v425_v31 = vpop.f32.mrb[4].mxu0  ;;  %v468_v32 = vpop.f32.mrb[4].mxu1  ;;  %1152 = vmatmul.mubr.msk.bf16.vlgmr.msra.gmra.mrb[12].mxu0 %vm294_vm3, %v1215_v30  ;;  %1158 = vmatmul.mubr.msk.bf16.vlgmr.msra.gmra.mrb[12].mxu1 %vm294_vm3, %v1215_v30 }
 0x101   : > { %v562_v33 = vpack.c.bf16 %v425_v31, %v425_v31  ;;  %v563_v34 = vpack.c.bf16 %v468_v32, %v468_v32  ;;  %v1129_v35 = vpop.f32.mrb[5].mxu0  ;;  %v1135_v36 = vpop.f32.mrb[5].mxu1  ;;  %1163 = vmatprep.mubr.msk.bf16.mxu0 %vm1257_vm2, %v1255_v1  ;;  %1169 = vmatprep.mubr.msk.bf16.mxu1 %vm1257_vm2, %v1255_v1 }
 0x102   : > { %v428_v37 = vpop.f32.mrb[6].mxu0  ;;  %v471_v38 = vpop.f32.mrb[6].mxu1 }
 0x103   : > { %v665_v39 = vand.u32 %v562_v33, %v1316_v4  ;;  %v709_v40 = vand.u32 %v563_v34, %v1316_v4  ;;  %v1130_v41 = vpop.f32.mrb[7].mxu0  ;;  %v1136_v42 = vpop.f32.mrb[7].mxu1 }
 0x105   : > { %1162 = vmatpush3.bf16.msra.mxu0 %v665_v39  ;;  %1168 = vmatpush3.bf16.msra.mxu1 %v709_v40 }
 0x106   : > { %1173 = vmatprep.subr.bf16.mxu0 %v1255_v1  ;;  %1179 = vmatprep.subr.bf16.mxu1 %v1255_v1 }
 0x108   : > { %v511_v43 = vpop.f32.mrb[8].mxu0  ;;  %v554_v44 = vpop.f32.mrb[8].mxu1  ;;  %1164 = vmatmul.mubr.msk.bf16.vlgmr.msra.gmra.mrb[16].mxu0 %vm294_vm3, %v1215_v30  ;;  %1170 = vmatmul.mubr.msk.bf16.vlgmr.msra.gmra.mrb[16].mxu1 %vm294_vm3, %v1215_v30 }
 0x109   : > { %v564_v45 = vpack.c.bf16 %v511_v43, %v511_v43  ;;  %v565_v46 = vpack.c.bf16 %v554_v44, %v554_v44  ;;  %v1141_v47 = vpop.f32.mrb[9].mxu0  ;;  %v1147_v48 = vpop.f32.mrb[9].mxu1  ;;  %1175 = vmatprep.mubr.msk.bf16.mxu0 %vm1257_vm2, %v1255_v1  ;;  %1181 = vmatprep.mubr.msk.bf16.mxu1 %vm1257_vm2, %v1255_v1 }
 0x10a   : > { %v514_v49 = vpop.f32.mrb[10].mxu0  ;;  %v557_v50 = vpop.f32.mrb[10].mxu1 }
 0x10b   : > { %v753_v51 = vand.u32 %v564_v45, %v1316_v4  ;;  %v797_v52 = vand.u32 %v565_v46, %v1316_v4  ;;  %v1142_v53 = vpop.f32.mrb[11].mxu0  ;;  %v1148_v54 = vpop.f32.mrb[11].mxu1 }
 0x10d   : > { %1174 = vmatpush3.bf16.msra.mxu0 %v753_v51  ;;  %1180 = vmatpush3.bf16.msra.mxu1 %v797_v52 }
 0x110   : > { %1176 = vmatmul.mubr.msk.bf16.vlgmr.msra.gmra.mrb[20].mxu0 %vm294_vm3, %v1215_v30  ;;  %1182 = vmatmul.mubr.msk.bf16.vlgmr.msra.gmra.mrb[20].mxu1 %vm294_vm3, %v1215_v30 }
 0x1d3   : > { %v613_v55 = vpop.f32.mrb[12].mxu0  ;;  %v657_v56 = vpop.f32.mrb[12].mxu1 }
 0x1d4   : > { %841 = vst.msk [vmem:[%s1413_s20] sm:$0xff] %vm275_vm4, %v613_v55  ;;  %844 = vst.msk [vmem:[%s1413_s20 + $0x10] sm:$0xff] %vm275_vm4, %v657_v56  ;;  %v1153_v57 = vpop.f32.mrb[13].mxu0  ;;  %v1159_v58 = vpop.f32.mrb[13].mxu1  ;;  %v868_v16 = vsel (!%p1338_p12), %vm865_vm6, %v613_v55, 0.0  ;;  %v870_v17 = vsel (!%p1338_p12), %vm866_vm7, %v657_v56, 0.0 }
 0x1d5   : > { %v616_v59 = vpop.f32.mrb[14].mxu0  ;;  %v660_v60 = vpop.f32.mrb[14].mxu1  ;;  %v874_v20 = vsel (!%p1338_p12), %vm275_vm4, %v868_v16, 0.0  ;;  %v875_v21 = vsel (!%p1338_p12), %vm275_vm4, %v870_v17, 0.0 }
 0x1d6   : > { %843 = vst.msk [vmem:[%s1413_s20 + $0x8] sm:$0x3f] %vm277_vm5, %v616_v59  ;;  %845 = vst.msk [vmem:[%s1413_s20 + $0x18] sm:$0x3f] %vm277_vm5, %v660_v60  ;;  %v1154_v61 = vpop.f32.mrb[15].mxu0  ;;  %v1160_v62 = vpop.f32.mrb[15].mxu1  ;;  %v876_v24 = vadd.f32 (!%p1338_p12), %v875_v21, %v874_v20 }
 0x1d7   : > { %v869_v19 = vsel (!%p1338_p12), %vm865_vm6, %v616_v59, 0.0  ;;  %v871_v23 = vsel (!%p1338_p12), %vm866_vm7, %v660_v60, 0.0 }
 0x1d8   : > { %v879_v26 = vsel (!%p1338_p12), %vm277_vm5, %v869_v19, 0.0  ;;  %v880_v27 = vsel (!%p1338_p12), %vm277_vm5, %v871_v23, 0.0 }
 0x1d9   : > { %v881_v28 = vadd.f32 (!%p1338_p12), %v880_v27, %v879_v26 }
 0x1db   : > { %v701_v63 = vpop.f32.mrb[16].mxu0  ;;  %v745_v0 = vpop.f32.mrb[16].mxu1 }
 0x1dc   : > { %846 = vst.msk [vmem:[%s1413_s20 + $0x20] sm:$0xff] %vm275_vm4, %v701_v63  ;;  %848 = vst.msk [vmem:[%s1413_s20 + $0x30] sm:$0xff] %vm275_vm4, %v745_v0  ;;  %v1165_v1 = vpop.f32.mrb[17].mxu0  ;;  %v1171_v2 = vpop.f32.mrb[17].mxu1  ;;  %v872_v18 = vsel (!%p1338_p12), %vm867_vm8, %v701_v63, 0.0 }
 0x1dd   : > { %v704_v3 = vpop.f32.mrb[18].mxu0  ;;  %v748_v4 = vpop.f32.mrb[18].mxu1  ;;  %v877_v22 = vsel (!%p1338_p12), %vm275_vm4, %v872_v18, 0.0 }
 0x1de   : > { %847 = vst.msk [vmem:[%s1413_s20 + $0x28] sm:$0x3f] %vm277_vm5, %v704_v3  ;;  %849 = vst.msk [vmem:[%s1413_s20 + $0x38] sm:$0x3f] %vm277_vm5, %v748_v4  ;;  %v1166_v5 = vpop.f32.mrb[19].mxu0  ;;  %v1172_v6 = vpop.f32.mrb[19].mxu1  ;;  %v878_v30 = vadd.f32 (!%p1338_p12), %v877_v22, %v876_v24 }
 0x1df   : > { %v873_v25 = vsel (!%p1338_p12), %vm867_vm8, %v704_v3, 0.0 }
 0x1e0   : > { %863 = sbr.rel (%p1338_p12) target bundleno = 488 (0x1e8), region = 40  ;;  %v882_v29 = vsel (!%p1338_p12), %vm277_vm5, %v873_v25, 0.0  ;;  %v884_v32 = vand.u32 (!%p1338_p12), 2147483647, %v878_v30 }
 0x1e1   : > { %v883_v31 = vadd.f32 (!%p1338_p12), %v882_v29, %v881_v28 }
 0x1e2   : > { %v886_v34 = vsub.f32 (!%p1338_p12), 0.0, %v884_v32 }
 0x1e3   : > { %v789_v7 = vpop.f32.mrb[20].mxu0  ;;  %v833_v8 = vpop.f32.mrb[20].mxu1  ;;  %v885_v33 = vand.u32 (!%p1338_p12), 2147483647, %v883_v31 }
 0x1e4   : > { %850 = vst.msk [vmem:[%s1413_s20 + $0x40] sm:$0xff] %vm275_vm4, %v789_v7  ;;  %852 = vst.msk [vmem:[%s1413_s20 + $0x50] sm:$0xff] %vm275_vm4, %v833_v8  ;;  %v1177_v9 = vpop.f32.mrb[21].mxu0  ;;  %v1183_v10 = vpop.f32.mrb[21].mxu1 }
 0x1e5   : > { %v792_v11 = vpop.f32.mrb[22].mxu0  ;;  %v836_v12 = vpop.f32.mrb[22].mxu1  ;;  %v887_v35 = vsub.f32 (!%p1338_p12), 0.0, %v885_v33  ;;  %888 = vst.msk [vmem:[%s1368_s14] sm:$0xff] (!%p1338_p12), %vm275_vm4, %v886_v34 }
 0x1e6   : > { %851 = vst.msk [vmem:[%s1413_s20 + $0x48] sm:$0x3f] %vm277_vm5, %v792_v11  ;;  %853 = vst.msk [vmem:[%s1413_s20 + $0x58] sm:$0x3f] %vm277_vm5, %v836_v12  ;;  %v1178_v13 = vpop.f32.mrb[23].mxu0  ;;  %v1184_v14 = vpop.f32.mrb[23].mxu1 }
 0x1e7   : > { %889 = vst.msk [vmem:[%s1368_s14 + $0x8] sm:$0x3f] %vm277_vm5, %v887_v35 }
 0x1e8 PF: > { %s890_s21 = sadd.s32 1, %s1314_s28 }
 0x1e9   : > { %s891_s22 = sld [smem:[#allocation3 + %s890_s21]] }
 0x1ef   : > { %p893_p13 = scmp.ge.s32.totalorder %s891_s22, 0  ;;  %p894_p0 = scmp.lt.s32.totalorder %s891_s22, 3 }
 0x1f1   : > { %p895_p1 = pnand %p894_p0, %p893_p13 }
 0x1f2   : > { %v899_v36 = vstv (!%p895_p1), %s891_s22 }
 0x1f3   : > { %898 = sbr.rel (%p895_p1) target bundleno = 512 (0x200), region = 44  ;;  %vm900_vm9 = vcmp.eq.s32.totalorder (!%p895_p1), %v899_v36, 0  ;;  %vm901_vm10 = vcmp.eq.s32.totalorder (!%p895_p1), %v899_v36, 1  ;;  %vm902_vm11 = vcmp.eq.s32.totalorder (!%p895_p1), %v899_v36, 2 }
 0x1f4   : > { %v903_v37 = vsel (!%p895_p1), %vm900_vm9, %v745_v0, 0.0  ;;  %v905_v38 = vsel (!%p895_p1), %vm901_vm10, %v789_v7, 0.0  ;;  %v907_v39 = vsel (!%p895_p1), %vm902_vm11, %v833_v8, 0.0  ;;  %v904_v40 = vsel (!%p895_p1), %vm900_vm9, %v748_v4, 0.0 }
 0x1f5   : > { %v909_v41 = vsel (!%p895_p1), %vm275_vm4, %v903_v37, 0.0  ;;  %v910_v42 = vsel (!%p895_p1), %vm275_vm4, %v905_v38, 0.0  ;;  %v912_v43 = vsel (!%p895_p1), %vm275_vm4, %v907_v39, 0.0  ;;  %v906_v44 = vsel (!%p895_p1), %vm901_vm10, %v792_v11, 0.0 }
 0x1f6   : > { %v911_v45 = vadd.f32 (!%p895_p1), %v910_v42, %v909_v41  ;;  %v908_v46 = vsel (!%p895_p1), %vm902_vm11, %v836_v12, 0.0  ;;  %v914_v47 = vsel (!%p895_p1), %vm277_vm5, %v904_v40, 0.0  ;;  %v915_v48 = vsel (!%p895_p1), %vm277_vm5, %v906_v44, 0.0 }
 0x1f7   : > { %v916_v49 = vadd.f32 (!%p895_p1), %v915_v48, %v914_v47  ;;  %v917_v50 = vsel (!%p895_p1), %vm277_vm5, %v908_v46, 0.0 }
 0x1f8   : > { %v913_v51 = vadd.f32 (!%p895_p1), %v912_v43, %v911_v45 }
 0x1f9   : > { %v918_v52 = vadd.f32 (!%p895_p1), %v917_v50, %v916_v49 }
 0x1fa   : > { %v919_v53 = vand.u32 2147483647, %v913_v51 }
 0x1fb   : > { %v920_v54 = vand.u32 2147483647, %v918_v52 }
 0x1fc   : > { %v921_v55 = vsub.f32 0.0, %v919_v53 }
 0x1fd   : > { %v922_v56 = vsub.f32 0.0, %v920_v54 }
 0x1fe   : > { %1084 = vst.msk [vmem:[%s1368_s14 + $0x10] sm:$0xff] %vm275_vm4, %v921_v55 }
 0x1ff   : > { %1085 = vst.msk [vmem:[%s1368_s14 + $0x18] sm:$0x3f] %vm277_vm5, %v922_v56 }
 0x200 PF: > { %s22_s25 = sadd.s32 1, %s1252_s25   ;;  %s1479_s23 = smov %s1248_s24 }
 0x201   : > { %p19_p2 = scmp.ge.s32.totalorder %s22_s25, 4   ;;  %s1480_s24 = smov %s1482_s0 }
 0x203   :  { %21 = sbr.rel (!%p19_p2) target bundleno = 17 (0x11), region = 87 }

</bundles_post_ra>
